<compile_context>
chip_gen: v7x
topology: tpu7x:2x2x1
jax: 0.10.0
libtpu: 0.0.40
codegen_flags: <defaults>
</compile_context>

<pallas_src>
import jax
import jax.numpy as jnp
from jax.experimental import pallas as pl
from jax.experimental.pallas import tpu as pltpu

IN_DIM = 28 * 28

# (in, out) dims for the 8 Linear layers (encoder then decoder)
LAYER_DIMS = [
    (IN_DIM, 128), (128, 64), (64, 12), (12, 3),      # encoder
    (3, 12), (12, 64), (64, 128), (128, IN_DIM),       # decoder
]

# Per-grid-step pipeline overhead (~0.35 us) expressed in equivalent bf16
# in+out DMA rows (784 * 2 dtypes * 2 bytes ~= 3.1 KB/row @ ~1.3 TB/s).
_STEP_OVERHEAD_ROWS = 128


def _round_up(a, m):
    return (a + m - 1) // m * m


def _sigmoid_dtype():
    """bf16 transcendentals on v6e/v7x (bf16 EUP); f32 on v5e and older."""
    try:
        kind = jax.devices()[0].device_kind.lower()
    except Exception:
        return jnp.float32
    if any(v in kind for v in ("v2", "v3", "v4", "v5")):
        return jnp.float32
    return jnp.bfloat16


def _make_kernel(sigmoid_dtype):
    n_layers = len(LAYER_DIMS)

    def kernel(x_ref, *refs):
        # refs = (w1, b1, ..., w8, b8, out_ref)
        out_ref = refs[-1]
        param_refs = refs[:-1]

        h = x_ref[...]                           # (tile, 784) bf16 (no cast needed for layer 0)
        for li in range(n_layers):
            w_ref = param_refs[2 * li]           # bf16 (in, out)
            b_ref = param_refs[2 * li + 1]       # f32  (1, out)
            # bf16 MXU matmul, f32 accumulation; bias add in f32.
            z = jnp.dot(h.astype(jnp.bfloat16), w_ref[...],
                        preferred_element_type=jnp.float32) + b_ref[...]
            if li < n_layers - 1:
                h = jnp.maximum(z, 0.0)          # ReLU on the VPU (f32, v5e-safe)
            else:
                # Sigmoid over the widest (tile, 784) tensor: exp on the EUP in
                # `sigmoid_dtype` (bf16 on v6e/v7x, f32 on v5e).  Clip keeps
                # exp finite so the approximate reciprocal never sees inf.
                zc = jnp.clip(z, -30.0, 30.0).astype(sigmoid_dtype)
                e = jnp.exp(-zc)                                   # EUP
                h = pl.reciprocal(1.0 + e.astype(jnp.float32),     # EUP (approx vrcp)
                                  approx=True)
        out_ref[...] = h.astype(out_ref.dtype)

    return kernel


def _choose_tile(B, b_tile):
    """Batch tile: multiple of 16, <= b_tile, >= 2 grid steps when possible,
    minimizing (padded rows + per-step overhead)."""
    b_tile = max(16, int(b_tile))
    # Cap so the grid has at least 2 steps (v7x dual-TensorCore sharding).
    cap = max(16, min(b_tile, _round_up(pl.cdiv(_round_up(B, 16), 2), 16)))
    best_t, best_cost = 16, None
    for t in range(16, cap + 1, 16):
        n = pl.cdiv(B, t)
        cost = n * (t + _STEP_OVERHEAD_ROWS)   # padded work + per-step overhead
        if best_cost is None or cost < best_cost or (cost == best_cost and t > best_t):
            best_t, best_cost = t, cost
    return best_t


def autoencoder_forward(x, params, *, b_tile=1024):
    """x: (B, 784), any float dtype (bf16 preferred — avoids an extra cast).
    params: flat list [w1(bf16,(in,out)), b1(f32,(1,out)), ...].
    Returns bf16 (B, 784)."""
    B, D = x.shape
    assert D == IN_DIM

    # bf16 HBM I/O — the kernel is memory-bound; halving I/O bytes is the
    # dominant win on every TPU generation.
    if x.dtype != jnp.bfloat16:
        x = x.astype(jnp.bfloat16)

    tile = _choose_tile(B, b_tile)
    B_pad = _round_up(B, tile)
    if B_pad != B:
        x = jnp.pad(x, ((0, B_pad - B), (0, 0)))
    grid = (B_pad // tile,)

    in_specs = [pl.BlockSpec((tile, D), lambda i: (i, 0))]
    for p in params:
        # Full-array blocks with a constant block index -> weights/biases stay
        # resident in VMEM across all grid steps (no per-step DMA).
        in_specs.append(pl.BlockSpec(p.shape, lambda i: (0, 0)))
    out_spec = pl.BlockSpec((tile, D), lambda i: (i, 0))

    param_bytes = sum(int(p.size) * p.dtype.itemsize for p in params)
    flops = 2 * B_pad * sum(fi * fo for fi, fo in LAYER_DIMS)
    cost = pl.CostEstimate(
        flops=flops,
        transcendentals=2 * B_pad * IN_DIM,          # exp + reciprocal (output layer)
        bytes_accessed=2 * B_pad * D * 2 + param_bytes,
    )

    # VMEM budget: double-buffered bf16 in+out tiles, 2x resident params, plus
    # generous headroom for the f32 elementwise temporaries of the widest
    # (tile, 784) layer.  ~29 MiB at the default tile=1024 — comfortable on
    # v5e/v6e (128 MiB) and within v7x's 64 MiB.
    vmem_limit = int(4 * tile * D * 2        # in+out tiles, bf16, double-buffered
                     + 2 * param_bytes       # weights/biases (default 2-deep)
                     + 6 * tile * D * 4      # f32-scale elementwise temporaries
                     + (2 << 20))            # slack

    out = pl.pallas_call(
        _make_kernel(_sigmoid_dtype()),
        out_shape=jax.ShapeDtypeStruct((B_pad, D), jnp.bfloat16),
        grid=grid,
        in_specs=in_specs,
        out_specs=out_spec,
        compiler_params=pltpu.CompilerParams(
            dimension_semantics=("parallel",),   # shards batch steps across v7x's 2 TCs
            vmem_limit_bytes=vmem_limit,
        ),
        cost_estimate=cost,
    )(x, *params)

    return out[:B] if B_pad != B else out


def init_params(key):
    """PyTorch-Linear-style init (uniform +/- 1/sqrt(fan_in)).
    Weights stored (in, out) in bf16 (MXU operands); biases stay f32."""
    params = []
    for (fan_in, fan_out) in LAYER_DIMS:
        key, kw, kb = jax.random.split(key, 3)
        bound = 1.0 / jnp.sqrt(fan_in)
        w = jax.random.uniform(kw, (fan_in, fan_out), jnp.float32, -bound, bound)
        b = jax.random.uniform(kb, (1, fan_out), jnp.float32, -bound, bound)
        params.extend([w.astype(jnp.bfloat16), b])
    return params


def reference_forward(x, params):
    """Pure-JAX reference mirroring the kernel numerics (bf16 in, bf16 matmuls,
    f32 accumulation, exact sigmoid)."""
    h = x.astype(jnp.bfloat16)
    n_layers = len(LAYER_DIMS)
    for li in range(n_layers):
        w, b = params[2 * li], params[2 * li + 1]
        z = jnp.dot(h.astype(jnp.bfloat16), w,
                    preferred_element_type=jnp.float32) + b
        h = jnp.maximum(z, 0.0) if li < n_layers - 1 else jax.nn.sigmoid(z)
    return h


if __name__ == "__main__":
    key = jax.random.PRNGKey(0)
    key, kx = jax.random.split(key)

    B = 32
    x = jax.random.normal(kx, (B, IN_DIM), jnp.float32).astype(jnp.bfloat16)
    params = init_params(key)

    out = jax.block_until_ready(autoencoder_forward(x, params))
    ref = reference_forward(x, params)

    assert out.shape == (B, IN_DIM)
    assert out.dtype == jnp.bfloat16
    # Sigmoid outputs live in [0, 1]; bf16 I/O + bf16 matmuls + bf16/approx
    # sigmoid vs the exact-sigmoid bf16-matmul reference -> loose-but-meaningful
    # absolute tolerance.
    err = jnp.max(jnp.abs(out.astype(jnp.float32) - ref.astype(jnp.float32)))
    assert err < 2e-2, f"mismatch vs JAX reference: max abs err {err}"

    print("KERNEL_OK")
</pallas_src>

<mosaic_0001>
module attributes {stable_mosaic.version = 11 : i64} {
  func.func @kernel(%arg0: i32, %arg1: memref<16x784xbf16, #tpu.memory_space<vmem>>, %arg2: memref<784x128xbf16, #tpu.memory_space<vmem>>, %arg3: memref<1x128xf32, #tpu.memory_space<vmem>>, %arg4: memref<128x64xbf16, #tpu.memory_space<vmem>>, %arg5: memref<1x64xf32, #tpu.memory_space<vmem>>, %arg6: memref<64x12xbf16, #tpu.memory_space<vmem>>, %arg7: memref<1x12xf32, #tpu.memory_space<vmem>>, %arg8: memref<12x3xbf16, #tpu.memory_space<vmem>>, %arg9: memref<1x3xf32, #tpu.memory_space<vmem>>, %arg10: memref<3x12xbf16, #tpu.memory_space<vmem>>, %arg11: memref<1x12xf32, #tpu.memory_space<vmem>>, %arg12: memref<12x64xbf16, #tpu.memory_space<vmem>>, %arg13: memref<1x64xf32, #tpu.memory_space<vmem>>, %arg14: memref<64x128xbf16, #tpu.memory_space<vmem>>, %arg15: memref<1x128xf32, #tpu.memory_space<vmem>>, %arg16: memref<128x784xbf16, #tpu.memory_space<vmem>>, %arg17: memref<1x784xf32, #tpu.memory_space<vmem>>, %arg18: memref<16x784xbf16, #tpu.memory_space<vmem>>) attributes {dimension_semantics = [#tpu.dimension_semantics<parallel>], iteration_bounds = array<i64: 2>, scalar_prefetch = 0 : i64, scratch_operands = 0 : i64, tpu.core_type = #tpu.core_type<tc>, window_params = [{transform_indices = @transform_0, window_bounds = array<i64: 16, 784>}, {pipeline_mode = #tpu.pipeline_mode<synchronous>, transform_indices = @transform_1, window_bounds = array<i64: 784, 128>}, {pipeline_mode = #tpu.pipeline_mode<synchronous>, transform_indices = @transform_2, window_bounds = array<i64: 1, 128>}, {pipeline_mode = #tpu.pipeline_mode<synchronous>, transform_indices = @transform_3, window_bounds = array<i64: 128, 64>}, {pipeline_mode = #tpu.pipeline_mode<synchronous>, transform_indices = @transform_4, window_bounds = array<i64: 1, 64>}, {pipeline_mode = #tpu.pipeline_mode<synchronous>, transform_indices = @transform_5, window_bounds = array<i64: 64, 12>}, {pipeline_mode = #tpu.pipeline_mode<synchronous>, transform_indices = @transform_6, window_bounds = array<i64: 1, 12>}, {pipeline_mode = #tpu.pipeline_mode<synchronous>, transform_indices = @transform_7, window_bounds = array<i64: 12, 3>}, {pipeline_mode = #tpu.pipeline_mode<synchronous>, transform_indices = @transform_8, window_bounds = array<i64: 1, 3>}, {pipeline_mode = #tpu.pipeline_mode<synchronous>, transform_indices = @transform_9, window_bounds = array<i64: 3, 12>}, {pipeline_mode = #tpu.pipeline_mode<synchronous>, transform_indices = @transform_10, window_bounds = array<i64: 1, 12>}, {pipeline_mode = #tpu.pipeline_mode<synchronous>, transform_indices = @transform_11, window_bounds = array<i64: 12, 64>}, {pipeline_mode = #tpu.pipeline_mode<synchronous>, transform_indices = @transform_12, window_bounds = array<i64: 1, 64>}, {pipeline_mode = #tpu.pipeline_mode<synchronous>, transform_indices = @transform_13, window_bounds = array<i64: 64, 128>}, {pipeline_mode = #tpu.pipeline_mode<synchronous>, transform_indices = @transform_14, window_bounds = array<i64: 1, 128>}, {pipeline_mode = #tpu.pipeline_mode<synchronous>, transform_indices = @transform_15, window_bounds = array<i64: 128, 784>}, {pipeline_mode = #tpu.pipeline_mode<synchronous>, transform_indices = @transform_16, window_bounds = array<i64: 1, 784>}, {transform_indices = @transform_17, window_bounds = array<i64: 16, 784>}]} {
    %c0 = arith.constant 0 : index
    %c0_0 = arith.constant 0 : index
    %0 = vector.load %arg1[%c0, %c0_0] : memref<16x784xbf16, #tpu.memory_space<vmem>>, vector<16x784xbf16>
    %c0_1 = arith.constant 0 : index
    %c0_2 = arith.constant 0 : index
    %1 = vector.load %arg2[%c0_1, %c0_2] : memref<784x128xbf16, #tpu.memory_space<vmem>>, vector<784x128xbf16>
    %cst = arith.constant dense<0.000000e+00> : vector<16x128xf32>
    %2 = tpu.matmul %0, %1, %cst {dimension_numbers = #tpu.dot_dimension_numbers<[1], [0], [0], [1], [0, 0, 1, 1], [], []>} : vector<16x784xbf16>, vector<784x128xbf16>, vector<16x128xf32> -> vector<16x128xf32>
    %c0_3 = arith.constant 0 : index
    %c0_4 = arith.constant 0 : index
    %3 = vector.load %arg3[%c0_3, %c0_4] : memref<1x128xf32, #tpu.memory_space<vmem>>, vector<1x128xf32>
    %4 = vector.broadcast %3 : vector<1x128xf32> to vector<16x128xf32>
    %5 = arith.addf %2, %4 : vector<16x128xf32>
    %cst_5 = arith.constant 0.000000e+00 : f32
    %6 = vector.broadcast %cst_5 : f32 to vector<16x128xf32>
    %7 = arith.maximumf %5, %6 : vector<16x128xf32>
    %8 = arith.truncf %7 : vector<16x128xf32> to vector<16x128xbf16>
    %c0_6 = arith.constant 0 : index
    %c0_7 = arith.constant 0 : index
    %9 = vector.load %arg4[%c0_6, %c0_7] : memref<128x64xbf16, #tpu.memory_space<vmem>>, vector<128x64xbf16>
    %cst_8 = arith.constant dense<0.000000e+00> : vector<16x64xf32>
    %10 = tpu.matmul %8, %9, %cst_8 {dimension_numbers = #tpu.dot_dimension_numbers<[1], [0], [0], [1], [0, 0, 1, 1], [], []>} : vector<16x128xbf16>, vector<128x64xbf16>, vector<16x64xf32> -> vector<16x64xf32>
    %c0_9 = arith.constant 0 : index
    %c0_10 = arith.constant 0 : index
    %11 = vector.load %arg5[%c0_9, %c0_10] : memref<1x64xf32, #tpu.memory_space<vmem>>, vector<1x64xf32>
    %12 = vector.broadcast %11 : vector<1x64xf32> to vector<16x64xf32>
    %13 = arith.addf %10, %12 : vector<16x64xf32>
    %cst_11 = arith.constant 0.000000e+00 : f32
    %14 = vector.broadcast %cst_11 : f32 to vector<16x64xf32>
    %15 = arith.maximumf %13, %14 : vector<16x64xf32>
    %16 = arith.truncf %15 : vector<16x64xf32> to vector<16x64xbf16>
    %c0_12 = arith.constant 0 : index
    %c0_13 = arith.constant 0 : index
    %17 = vector.load %arg6[%c0_12, %c0_13] : memref<64x12xbf16, #tpu.memory_space<vmem>>, vector<64x12xbf16>
    %cst_14 = arith.constant dense<0.000000e+00> : vector<16x12xf32>
    %18 = tpu.matmul %16, %17, %cst_14 {dimension_numbers = #tpu.dot_dimension_numbers<[1], [0], [0], [1], [0, 0, 1, 1], [], []>} : vector<16x64xbf16>, vector<64x12xbf16>, vector<16x12xf32> -> vector<16x12xf32>
    %c0_15 = arith.constant 0 : index
    %c0_16 = arith.constant 0 : index
    %19 = vector.load %arg7[%c0_15, %c0_16] : memref<1x12xf32, #tpu.memory_space<vmem>>, vector<1x12xf32>
    %20 = vector.broadcast %19 : vector<1x12xf32> to vector<16x12xf32>
    %21 = arith.addf %18, %20 : vector<16x12xf32>
    %cst_17 = arith.constant 0.000000e+00 : f32
    %22 = vector.broadcast %cst_17 : f32 to vector<16x12xf32>
    %23 = arith.maximumf %21, %22 : vector<16x12xf32>
    %24 = arith.truncf %23 : vector<16x12xf32> to vector<16x12xbf16>
    %c0_18 = arith.constant 0 : index
    %c0_19 = arith.constant 0 : index
    %25 = vector.load %arg8[%c0_18, %c0_19] : memref<12x3xbf16, #tpu.memory_space<vmem>>, vector<12x3xbf16>
    %cst_20 = arith.constant dense<0.000000e+00> : vector<16x3xf32>
    %26 = tpu.matmul %24, %25, %cst_20 {dimension_numbers = #tpu.dot_dimension_numbers<[1], [0], [0], [1], [0, 0, 1, 1], [], []>} : vector<16x12xbf16>, vector<12x3xbf16>, vector<16x3xf32> -> vector<16x3xf32>
    %c0_21 = arith.constant 0 : index
    %c0_22 = arith.constant 0 : index
    %27 = vector.load %arg9[%c0_21, %c0_22] : memref<1x3xf32, #tpu.memory_space<vmem>>, vector<1x3xf32>
    %28 = vector.broadcast %27 : vector<1x3xf32> to vector<16x3xf32>
    %29 = arith.addf %26, %28 : vector<16x3xf32>
    %cst_23 = arith.constant 0.000000e+00 : f32
    %30 = vector.broadcast %cst_23 : f32 to vector<16x3xf32>
    %31 = arith.maximumf %29, %30 : vector<16x3xf32>
    %32 = arith.truncf %31 : vector<16x3xf32> to vector<16x3xbf16>
    %c0_24 = arith.constant 0 : index
    %c0_25 = arith.constant 0 : index
    %33 = vector.load %arg10[%c0_24, %c0_25] : memref<3x12xbf16, #tpu.memory_space<vmem>>, vector<3x12xbf16>
    %cst_26 = arith.constant dense<0.000000e+00> : vector<16x12xf32>
    %34 = tpu.matmul %32, %33, %cst_26 {dimension_numbers = #tpu.dot_dimension_numbers<[1], [0], [0], [1], [0, 0, 1, 1], [], []>} : vector<16x3xbf16>, vector<3x12xbf16>, vector<16x12xf32> -> vector<16x12xf32>
    %c0_27 = arith.constant 0 : index
    %c0_28 = arith.constant 0 : index
    %35 = vector.load %arg11[%c0_27, %c0_28] : memref<1x12xf32, #tpu.memory_space<vmem>>, vector<1x12xf32>
    %36 = vector.broadcast %35 : vector<1x12xf32> to vector<16x12xf32>
    %37 = arith.addf %34, %36 : vector<16x12xf32>
    %cst_29 = arith.constant 0.000000e+00 : f32
    %38 = vector.broadcast %cst_29 : f32 to vector<16x12xf32>
    %39 = arith.maximumf %37, %38 : vector<16x12xf32>
    %40 = arith.truncf %39 : vector<16x12xf32> to vector<16x12xbf16>
    %c0_30 = arith.constant 0 : index
    %c0_31 = arith.constant 0 : index
    %41 = vector.load %arg12[%c0_30, %c0_31] : memref<12x64xbf16, #tpu.memory_space<vmem>>, vector<12x64xbf16>
    %cst_32 = arith.constant dense<0.000000e+00> : vector<16x64xf32>
    %42 = tpu.matmul %40, %41, %cst_32 {dimension_numbers = #tpu.dot_dimension_numbers<[1], [0], [0], [1], [0, 0, 1, 1], [], []>} : vector<16x12xbf16>, vector<12x64xbf16>, vector<16x64xf32> -> vector<16x64xf32>
    %c0_33 = arith.constant 0 : index
    %c0_34 = arith.constant 0 : index
    %43 = vector.load %arg13[%c0_33, %c0_34] : memref<1x64xf32, #tpu.memory_space<vmem>>, vector<1x64xf32>
    %44 = vector.broadcast %43 : vector<1x64xf32> to vector<16x64xf32>
    %45 = arith.addf %42, %44 : vector<16x64xf32>
    %cst_35 = arith.constant 0.000000e+00 : f32
    %46 = vector.broadcast %cst_35 : f32 to vector<16x64xf32>
    %47 = arith.maximumf %45, %46 : vector<16x64xf32>
    %48 = arith.truncf %47 : vector<16x64xf32> to vector<16x64xbf16>
    %c0_36 = arith.constant 0 : index
    %c0_37 = arith.constant 0 : index
    %49 = vector.load %arg14[%c0_36, %c0_37] : memref<64x128xbf16, #tpu.memory_space<vmem>>, vector<64x128xbf16>
    %cst_38 = arith.constant dense<0.000000e+00> : vector<16x128xf32>
    %50 = tpu.matmul %48, %49, %cst_38 {dimension_numbers = #tpu.dot_dimension_numbers<[1], [0], [0], [1], [0, 0, 1, 1], [], []>} : vector<16x64xbf16>, vector<64x128xbf16>, vector<16x128xf32> -> vector<16x128xf32>
    %c0_39 = arith.constant 0 : index
    %c0_40 = arith.constant 0 : index
    %51 = vector.load %arg15[%c0_39, %c0_40] : memref<1x128xf32, #tpu.memory_space<vmem>>, vector<1x128xf32>
    %52 = vector.broadcast %51 : vector<1x128xf32> to vector<16x128xf32>
    %53 = arith.addf %50, %52 : vector<16x128xf32>
    %cst_41 = arith.constant 0.000000e+00 : f32
    %54 = vector.broadcast %cst_41 : f32 to vector<16x128xf32>
    %55 = arith.maximumf %53, %54 : vector<16x128xf32>
    %56 = arith.truncf %55 : vector<16x128xf32> to vector<16x128xbf16>
    %c0_42 = arith.constant 0 : index
    %c0_43 = arith.constant 0 : index
    %57 = vector.load %arg16[%c0_42, %c0_43] : memref<128x784xbf16, #tpu.memory_space<vmem>>, vector<128x784xbf16>
    %cst_44 = arith.constant dense<0.000000e+00> : vector<16x784xf32>
    %58 = tpu.matmul %56, %57, %cst_44 {dimension_numbers = #tpu.dot_dimension_numbers<[1], [0], [0], [1], [0, 0, 1, 1], [], []>} : vector<16x128xbf16>, vector<128x784xbf16>, vector<16x784xf32> -> vector<16x784xf32>
    %c0_45 = arith.constant 0 : index
    %c0_46 = arith.constant 0 : index
    %59 = vector.load %arg17[%c0_45, %c0_46] : memref<1x784xf32, #tpu.memory_space<vmem>>, vector<1x784xf32>
    %60 = vector.broadcast %59 : vector<1x784xf32> to vector<16x784xf32>
    %61 = arith.addf %58, %60 : vector<16x784xf32>
    %cst_47 = arith.constant -3.000000e+01 : f32
    %cst_48 = arith.constant 3.000000e+01 : f32
    %62 = vector.broadcast %cst_47 : f32 to vector<16x784xf32>
    %63 = arith.maximumf %62, %61 : vector<16x784xf32>
    %64 = vector.broadcast %cst_48 : f32 to vector<16x784xf32>
    %65 = arith.minimumf %64, %63 : vector<16x784xf32>
    %66 = arith.truncf %65 : vector<16x784xf32> to vector<16x784xbf16>
    %cst_49 = arith.constant 0.000000e+00 : bf16
    %67 = vector.broadcast %cst_49 : bf16 to vector<16x784xbf16>
    %68 = arith.subf %67, %66 : vector<16x784xbf16>
    %69 = math.exp %68 : vector<16x784xbf16>
    %70 = arith.extf %69 : vector<16x784xbf16> to vector<16x784xf32>
    %cst_50 = arith.constant 1.000000e+00 : f32
    %71 = vector.broadcast %cst_50 : f32 to vector<16x784xf32>
    %72 = arith.addf %71, %70 : vector<16x784xf32>
    %73 = tpu.reciprocal %72 {approx = true} : vector<16x784xf32> -> vector<16x784xf32>
    %74 = arith.truncf %73 : vector<16x784xf32> to vector<16x784xbf16>
    %c0_51 = arith.constant 0 : index
    %c0_52 = arith.constant 0 : index
    %75 = vector.load %arg18[%c0_51, %c0_52] : memref<16x784xbf16, #tpu.memory_space<vmem>>, vector<16x784xbf16>
    tpu.vector_store %arg18[%c0_51, %c0_52], %74 {strides = array<i32>} : memref<16x784xbf16, #tpu.memory_space<vmem>>, vector<16x784xbf16>,
    return
  }
  func.func @transform_0(%arg0: i32) -> (i32, i32) {
    %c0_i32 = arith.constant 0 : i32
    %c0_i32_0 = arith.constant 0 : i32
    return %arg0, %c0_i32 : i32, i32
  }
  func.func @transform_1(%arg0: i32) -> (i32, i32) {
    %c0_i32 = arith.constant 0 : i32
    %c0_i32_0 = arith.constant 0 : i32
    %c0_i32_1 = arith.constant 0 : i32
    return %c0_i32, %c0_i32_0 : i32, i32
  }
  func.func @transform_2(%arg0: i32) -> (i32, i32) {
    %c0_i32 = arith.constant 0 : i32
    %c0_i32_0 = arith.constant 0 : i32
    %c0_i32_1 = arith.constant 0 : i32
    return %c0_i32, %c0_i32_0 : i32, i32
  }
  func.func @transform_3(%arg0: i32) -> (i32, i32) {
    %c0_i32 = arith.constant 0 : i32
    %c0_i32_0 = arith.constant 0 : i32
    %c0_i32_1 = arith.constant 0 : i32
    return %c0_i32, %c0_i32_0 : i32, i32
  }
  func.func @transform_4(%arg0: i32) -> (i32, i32) {
    %c0_i32 = arith.constant 0 : i32
    %c0_i32_0 = arith.constant 0 : i32
    %c0_i32_1 = arith.constant 0 : i32
    return %c0_i32, %c0_i32_0 : i32, i32
  }
  func.func @transform_5(%arg0: i32) -> (i32, i32) {
    %c0_i32 = arith.constant 0 : i32
    %c0_i32_0 = arith.constant 0 : i32
    %c0_i32_1 = arith.constant 0 : i32
    return %c0_i32, %c0_i32_0 : i32, i32
  }
  func.func @transform_6(%arg0: i32) -> (i32, i32) {
    %c0_i32 = arith.constant 0 : i32
    %c0_i32_0 = arith.constant 0 : i32
    %c0_i32_1 = arith.constant 0 : i32
    return %c0_i32, %c0_i32_0 : i32, i32
  }
  func.func @transform_7(%arg0: i32) -> (i32, i32) {
    %c0_i32 = arith.constant 0 : i32
    %c0_i32_0 = arith.constant 0 : i32
    %c0_i32_1 = arith.constant 0 : i32
    return %c0_i32, %c0_i32_0 : i32, i32
  }
  func.func @transform_8(%arg0: i32) -> (i32, i32) {
    %c0_i32 = arith.constant 0 : i32
    %c0_i32_0 = arith.constant 0 : i32
    %c0_i32_1 = arith.constant 0 : i32
    return %c0_i32, %c0_i32_0 : i32, i32
  }
  func.func @transform_9(%arg0: i32) -> (i32, i32) {
    %c0_i32 = arith.constant 0 : i32
    %c0_i32_0 = arith.constant 0 : i32
    %c0_i32_1 = arith.constant 0 : i32
    return %c0_i32, %c0_i32_0 : i32, i32
  }
  func.func @transform_10(%arg0: i32) -> (i32, i32) {
    %c0_i32 = arith.constant 0 : i32
    %c0_i32_0 = arith.constant 0 : i32
    %c0_i32_1 = arith.constant 0 : i32
    return %c0_i32, %c0_i32_0 : i32, i32
  }
  func.func @transform_11(%arg0: i32) -> (i32, i32) {
    %c0_i32 = arith.constant 0 : i32
    %c0_i32_0 = arith.constant 0 : i32
    %c0_i32_1 = arith.constant 0 : i32
    return %c0_i32, %c0_i32_0 : i32, i32
  }
  func.func @transform_12(%arg0: i32) -> (i32, i32) {
    %c0_i32 = arith.constant 0 : i32
    %c0_i32_0 = arith.constant 0 : i32
    %c0_i32_1 = arith.constant 0 : i32
    return %c0_i32, %c0_i32_0 : i32, i32
  }
  func.func @transform_13(%arg0: i32) -> (i32, i32) {
    %c0_i32 = arith.constant 0 : i32
    %c0_i32_0 = arith.constant 0 : i32
    %c0_i32_1 = arith.constant 0 : i32
    return %c0_i32, %c0_i32_0 : i32, i32
  }
  func.func @transform_14(%arg0: i32) -> (i32, i32) {
    %c0_i32 = arith.constant 0 : i32
    %c0_i32_0 = arith.constant 0 : i32
    %c0_i32_1 = arith.constant 0 : i32
    return %c0_i32, %c0_i32_0 : i32, i32
  }
  func.func @transform_15(%arg0: i32) -> (i32, i32) {
    %c0_i32 = arith.constant 0 : i32
    %c0_i32_0 = arith.constant 0 : i32
    %c0_i32_1 = arith.constant 0 : i32
    return %c0_i32, %c0_i32_0 : i32, i32
  }
  func.func @transform_16(%arg0: i32) -> (i32, i32) {
    %c0_i32 = arith.constant 0 : i32
    %c0_i32_0 = arith.constant 0 : i32
    %c0_i32_1 = arith.constant 0 : i32
    return %c0_i32, %c0_i32_0 : i32, i32
  }
  func.func @transform_17(%arg0: i32) -> (i32, i32) {
    %c0_i32 = arith.constant 0 : i32
    %c0_i32_0 = arith.constant 0 : i32
    return %arg0, %c0_i32 : i32, i32
  }
}

</mosaic_0001>

<bundles_post_ra>
// kernel: tpu_custom_call.1
= control target key start
LH: loop header
LB: loop body
LE: loop exit
PB: predicated region body
PF: predicated region fallthrough
CT: control target
= control target key end

     0   :  { %s3814_s0 = inlined_call_operand.vmem [shape: bf16[32,784], index: 0, kind: input, shape index: {}]   ;;  %s3815_s1 = inlined_call_operand.vmem [shape: bf16[784,128], index: 1, kind: input, shape index: {}]   ;;  %s3816_s2 = inlined_call_operand.vmem [shape: f32[1,128], index: 2, kind: input, shape index: {}]   ;;  %s3817_s3 = inlined_call_operand.vmem [shape: bf16[128,64], index: 3, kind: input, shape index: {}]   ;;  %s3818_s4 = inlined_call_operand.vmem [shape: f32[1,64], index: 4, kind: input, shape index: {}]   ;;  %s3819_s5 = inlined_call_operand.vmem [shape: bf16[64,12], index: 5, kind: input, shape index: {}]   ;;  %s3820_s6 = inlined_call_operand.vmem [shape: f32[1,12], index: 6, kind: input, shape index: {}]   ;;  %s3821_s7 = inlined_call_operand.vmem [shape: bf16[12,3], index: 7, kind: input, shape index: {}]   ;;  %s3822_s8 = inlined_call_operand.vmem [shape: f32[1,3], index: 8, kind: input, shape index: {}]   ;;  %s3823_s9 = inlined_call_operand.vmem [shape: bf16[3,12], index: 9, kind: input, shape index: {}]   ;;  %s3824_s10 = inlined_call_operand.vmem [shape: f32[1,12], index: 10, kind: input, shape index: {}]   ;;  %s3825_s11 = inlined_call_operand.vmem [shape: bf16[12,64], index: 11, kind: input, shape index: {}]   ;;  %s3826_s12 = inlined_call_operand.vmem [shape: f32[1,64], index: 12, kind: input, shape index: {}]   ;;  %s3827_s13 = inlined_call_operand.vmem [shape: bf16[64,128], index: 13, kind: input, shape index: {}]   ;;  %s3828_s14 = inlined_call_operand.vmem [shape: f32[1,128], index: 14, kind: input, shape index: {}]   ;;  %s3829_s15 = inlined_call_operand.vmem [shape: bf16[128,784], index: 15, kind: input, shape index: {}]   ;;  %s3830_s16 = inlined_call_operand.vmem [shape: f32[1,784], index: 16, kind: input, shape index: {}]   ;;  %s3831_s17 = inlined_call_operand.hbm [shape: bf16[32,784], index: 17, kind: output, shape index: {}]  }
   0x1   :  { %3840 = sst [smem:[#allocation11_spill]] %s3814_s0 }
   0x2   :  { %3841 = sst [smem:[#allocation12_spill]] %s3815_s1 }
   0x3   :  { %3842 = sst [smem:[#allocation13_spill]] %s3831_s17 }
   0x4   :  { %22 = vsyncpa [#allocation3], 0 }
   0x5   :  { %24 = vsyncpa [#allocation3 + $0x1], 0  ;;  %s3224_s24 = smov 0   ;;  %s3226_s25 = smov 0  }
   0x6   :  { %s3228_s26 = smov 0   ;;  %s3230_s27 = smov 0  }
   0x7 LB: > { %3843 = sst [smem:[#allocation5_spill]] %s3113_s24  ;;  %s3245_s28 = sadd.s32 4294967295, %s3125_s27   ;;  %s3125_s27 = sphi %s3230_s27, %s3857_s27   ;;  %s3121_s26 = sphi %s3228_s26, %s3859_s26   ;;  %s3117_s25 = sphi %s3226_s25, %s3861_s25   ;;  %s3113_s24 = sphi %s3224_s24, %s3860_s24  }
   0x8   : > { %3844 = sst [smem:[#allocation6_spill]] %s3121_s26  ;;  %s2442_s29 = sadd.s32 4294967294, %s3125_s27  }
   0x9   : > { %3845 = sst [smem:[#allocation7_spill]] %s3125_s27  ;;  %s3249_s0 = sadd.s32 1, %s3125_s27  }
   0xa   : > { %3846 = sst [smem:[#allocation8_spill]] %s3249_s0  ;;  %s399_s30 = sadd.s32 1, %s3121_s26 }
   0xb   : > { %s396_s18 = ssub.s32 %s3125_s27, %s3249_s0  ;;  %p409_p0 = scmp.ne.s32.totalorder %s3121_s26, %s3117_s25 }
   0xc   : > { %p397_p1 = scmp.eq.s32.totalorder %s396_s18, 0  ;;  %p410_p2 = scmp.eq.s32.totalorder %s3245_s28, 1 }
   0xd   : > { %p415_p3 = scmp.ne.s32.totalorder %s3117_s25, %s3113_s24  ;;  %p416_p4 = scmp.eq.s32.totalorder %s2442_s29, 1 }
   0xe   : > { %s3260_s19 = scalar_select %p397_p1, %s3121_s26, %s399_s30  }
   0xf   : > { %p3262_p5 = por %p410_p2, %p409_p0  ;;  %p3266_p6 = por %p416_p4, %p415_p3 }
  0x10   : > { %3847 = sst [smem:[#allocation9_spill]] %s3260_s19  ;;  %p2445_p7 = scmp.ge.s32.totalorder %s3125_s27, 1 }
  0x11   : > { %s3849_s20 = scalar_select %p3266_p6, 1, 0 }
  0x12   : > { %p492_p8 = scmp.lt.s32.totalorder %s3125_s27, 3 }
  0x13   : > { %3850 = sst [smem:[#allocation10_spill]] %s3849_s20 }
  0x14   : > { %p493_p9 = pnand %p2445_p7, %p492_p8 }
  0x15   : > { %s3851_s23 = sld [smem:[#allocation12_spill]] (!%p493_p9)  ;;  %s2446_s20 = sshll.u32 (!%p493_p9), %s3245_s28, 1  ;;  %v3127_v38 = vmov (!%p493_p9), 0.0   ;;  %vm3128_vm0 = vmmov (!%p493_p9), 0   ;;  %vm996_vm1 = vcmask (!%p493_p9), 130048   ;;  %v2923_v57 = vld [vmem:[%s3817_s3] sm:$0xff] (!%p493_p9)  }
  0x16   : > { %496 = sbr.rel (%p493_p9) target bundleno = 1942 (0x796), region = 88  ;;  %p546_p10 = scmp.lt.s32.totalorder (!%p493_p9), %s2446_s20, 3  ;;  %v2924_v58 = vld [vmem:[%s3817_s3 + $0x8] sm:$0xff] (!%p493_p9)   ;;  %v2925_v59 = vld [vmem:[%s3817_s3 + $0x10] sm:$0xff] (!%p493_p9)   ;;  %v2926_v60 = vld [vmem:[%s3817_s3 + $0x18] sm:$0xff] (!%p493_p9)   ;;  %vm1321_vm2 = vcmask (!%p493_p9), 523264  }
  0x17   : > { %s3852_s17 = sld [smem:[#allocation11_spill]] (!%p493_p9)  ;;  %v2927_v61 = vld [vmem:[%s3817_s3 + $0x20] sm:$0xff] (!%p493_p9)   ;;  %v2928_v62 = vld [vmem:[%s3817_s3 + $0x28] sm:$0xff] (!%p493_p9)   ;;  %v2929_v63 = vld [vmem:[%s3817_s3 + $0x30] sm:$0xff] (!%p493_p9)   ;;  %vm1387_vm3 = vcmask (!%p493_p9), 1045504   ;;  %vm1383_vm4 = vcmask (!%p493_p9), 97280  }
  0x18   : > { %vm1447_vm5 = vcmask (!%p493_p9), 1040384   ;;  %vm1448_vm6 = vcmask (!%p493_p9), 1041408   ;;  %vm1443_vm7 = vcmask (!%p493_p9), 23552   ;;  %s2818_s22 = smul.u32 (!%p493_p9), 896, %s3245_s28  ;;  %vm2359_vm8 = vcmask (!%p493_p9), 125952   ;;  %s3853_s19 = sld [smem:[#allocation13_spill]] (!%p493_p9) }
  0x19   : > { %s3131_s24 = smov (!%p493_p9), [#allocation2]  }
  0x1b   : > { %v2864_v0 = vld [vmem:[%s3851_s23 + $0x40] sm:$0xff] (!%p493_p9)   ;;  %v2868_v4 = vld [vmem:[%s3851_s23 + $0x48] sm:$0xff] (!%p493_p9)   ;;  %v2872_v8 = vld [vmem:[%s3851_s23 + $0x50] sm:$0xff] (!%p493_p9)  }
  0x1c   : > { %v2865_v1 = vld [vmem:[%s3851_s23] sm:$0xff] (!%p493_p9)   ;;  %2626 = vmatprep.subr.bf16.mxu0 (!%p493_p9), %v2864_v0  ;;  %v2869_v5 = vld [vmem:[%s3851_s23 + $0x8] sm:$0xff] (!%p493_p9)   ;;  %v2873_v9 = vld [vmem:[%s3851_s23 + $0x10] sm:$0xff] (!%p493_p9)  }
  0x1d   : > { %v2866_v2 = vld [vmem:[%s3851_s23 + $0xc0] sm:$0xff]   ;;  %2627 = vmatpush3.bf16.msra.mxu0 %v2865_v1  ;;  %v2870_v6 = vld [vmem:[%s3851_s23 + $0xc8] sm:$0xff]   ;;  %v2874_v10 = vld [vmem:[%s3851_s23 + $0xd0] sm:$0xff]   ;;  %s3863_s20 = smov (!%p546_p10, %s2446_s20), 3 }
  0x1e   : > { %v2867_v3 = vld [vmem:[%s3851_s23 + $0x80] sm:$0xff]   ;;  %2648 = vmatprep.subr.bf16.mxu1 %v2866_v2  ;;  %2628 = vmatprep.subr.bf16.mxu0 %v2868_v4  ;;  %v2871_v7 = vld [vmem:[%s3851_s23 + $0x88] sm:$0xff]   ;;  %v2875_v11 = vld [vmem:[%s3851_s23 + $0x90] sm:$0xff]   ;;  %s2817_s29 = smul.u32 28, %s3863_s20  ;;  %s3764_s26 = scalar_lea.hbm %s3853_s19, %s2818_s22 }
  0x1f   : > { %2649 = vmatpush3.bf16.msra.mxu1 %v2867_v3  ;;  %v2876_v12 = vld [vmem:[%s3851_s23 + $0x58] sm:$0xff]   ;;  %v2880_v16 = vld [vmem:[%s3851_s23 + $0x60] sm:$0xff]   ;;  %v2884_v20 = vld [vmem:[%s3851_s23 + $0x68] sm:$0xff]  }
  0x20   : > { %2650 = vmatprep.subr.bf16.mxu1 %v2870_v6  ;;  %v2877_v13 = vld [vmem:[%s3851_s23 + $0x18] sm:$0xff]   ;;  %v2881_v17 = vld [vmem:[%s3851_s23 + $0x20] sm:$0xff]   ;;  %v2885_v21 = vld [vmem:[%s3851_s23 + $0x28] sm:$0xff]   ;;  %s3363_s27 = scalar_lea.vmem %s3852_s17, %s2817_s29  ;;  %s542_s29 = sand.u32 1, %s3117_s25  }
  0x21   : > { %2629 = vmatpush3.bf16.msra.mxu0 %v2869_v5  ;;  %v2878_v14 = vld [vmem:[%s3851_s23 + $0xd8] sm:$0xff]   ;;  %v2882_v18 = vld [vmem:[%s3851_s23 + $0xe0] sm:$0xff]   ;;  %v2886_v22 = vld [vmem:[%s3851_s23 + $0xe8] sm:$0xff]   ;;  %s2816_s30 = smul.u32 56, %s542_s29  ;;  %s3773_s28 = scalar_lea.sflag [#allocation3], %s542_s29 }
  0x22   : > { %2630 = vmatprep.subr.bf16.mxu0 %v2872_v8  ;;  %v2879_v15 = vld [vmem:[%s3851_s23 + $0x98] sm:$0xff]   ;;  %v2883_v19 = vld [vmem:[%s3851_s23 + $0xa0] sm:$0xff]   ;;  %v2887_v23 = vld [vmem:[%s3851_s23 + $0xa8] sm:$0xff]   ;;  %s3067_s17 = sshll.u32 %s3131_s24, 4  ;;  %s3068_s17 = int_to_ptr.vmem [resolvable:$false] %s3067_s17 }
  0x23   : > { %2651 = vmatpush3.bf16.msra.mxu1 %v2871_v7  ;;  %v2888_v24 = vld [vmem:[%s3851_s23 + $0x70] sm:$0xff]   ;;  %v2892_v28 = vld [vmem:[%s3851_s23 + $0x78] sm:$0xff]   ;;  %v2897_v32 = vld [vmem:[%s3363_s27 + $0x4] ss:$28 sps:$4 sm:$0xff]   ;;  %s3752_s21 = scalar_lea.vmem [#allocation2], %s2816_s30  ;;  %s3069_s30 = scalar_lea.vmem %s3068_s17, 1792 }
  0x24   : > { %2652 = vmatprep.subr.bf16.mxu1 %v2874_v10  ;;  %v2889_v25 = vld [vmem:[%s3851_s23 + $0x30] sm:$0xff]   ;;  %v2893_v29 = vld [vmem:[%s3851_s23 + $0x38] sm:$0xff]   ;;  %1032 = vmatprep.mubr.bf16.mxu0 %v2897_v32  ;;  %v2899_v34 = vld [vmem:[%s3851_s23 + $0x140] sm:$0xff]   ;;  %s2380_s20 = sshll.u32 %s3752_s21, 4  ;;  %s3766_s20 = int_to_ptr.vmem [resolvable:$true] %s2380_s20 }
  0x25   : > { %2631 = vmatpush3.bf16.msra.mxu0 %v2873_v9  ;;  %v2890_v26 = vld [vmem:[%s3851_s23 + $0xf0] sm:$0xff]   ;;  %v2894_v30 = vld [vmem:[%s3851_s23 + $0xf8] sm:$0xff]   ;;  %v2900_v35 = vld [vmem:[%s3363_s27 + $0x8] ss:$28 sps:$4 sm:$0xff]   ;;  %s3063_s0 = scalar_lea.vmem %s3766_s20, 896  ;;  %p3070_p0 = scmp.lt.s32.totalorder %s3766_s20, %s3068_s17 }
  0x26   : > { %2632 = vmatprep.subr.bf16.mxu0 %v2876_v12  ;;  %v2891_v27 = vld [vmem:[%s3851_s23 + $0xb0] sm:$0xff]   ;;  %v2895_v31 = vld [vmem:[%s3363_s27] ss:$28 sps:$4 sm:$0xff]   ;;  %v2902_v36 = vld [vmem:[%s3363_s27 + $0xc] ss:$28 sps:$4 sm:$0xff]   ;;  %p3064_p11 = scmp.ne.s32.totalorder %s3766_s20, %s3063_s0  ;;  %p3071_p1 = scmp.lt.s32.totalorder %s3069_s30, %s3063_s0 }
  0x27   : > { %2653 = vmatpush3.bf16.msra.mxu1 %v2875_v11  ;;  %v2898_v33 = vld [vmem:[%s3851_s23 + $0xb8] sm:$0xff]   ;;  %v2903_v37 = vld [vmem:[%s3851_s23 + $0x100] sm:$0xff]   ;;  %1073 = vmatprep.mubr.bf16.mxu1 %v2902_v36  ;;  %v2904_v39 = vld [vmem:[%s3851_s23 + $0x148] sm:$0xff]  }
  0x28   : > { %2654 = vmatprep.subr.bf16.mxu1 %v2878_v14  ;;  %v2905_v40 = vld [vmem:[%s3851_s23 + $0x108] sm:$0xff]   ;;  %v2906_v41 = vld [vmem:[%s3851_s23 + $0x150] sm:$0xff]   ;;  %v2908_v43 = vld [vmem:[%s3851_s23 + $0x158] sm:$0xff]   ;;  %p3065_p12 = pnand %p3064_p11, %p3262_p5  ;;  %p3072_p2 = por %p3071_p1, %p3070_p0 }
  0x29   : > { %2633 = vmatpush3.bf16.msra.mxu0 %v2877_v13  ;;  %v2907_v42 = vld [vmem:[%s3851_s23 + $0x110] sm:$0xff]   ;;  %v2909_v44 = vld [vmem:[%s3851_s23 + $0x118] sm:$0xff]   ;;  %v2910_v45 = vld [vmem:[%s3851_s23 + $0x160] sm:$0xff]  }
  0x2a   : > { %2634 = vmatprep.subr.bf16.mxu0 %v2880_v16  ;;  %v2911_v46 = vld [vmem:[%s3851_s23 + $0x120] sm:$0xff]   ;;  %v2912_v47 = vld [vmem:[%s3851_s23 + $0x168] sm:$0xff]   ;;  %v2921_v50 = vld [vmem:[%s3363_s27 + $0x14] ss:$28 sps:$4 sm:$0xff]   ;;  %p3066_p13 = pneg %p3065_p12 }
  0x2b   : > { %2655 = vmatpush3.bf16.msra.mxu1 %v2879_v15  ;;  %v2918_v48 = vld [vmem:[%s3851_s23 + $0x180] sm:$0xff]   ;;  %v2913_v49 = vld [vmem:[%s3851_s23 + $0x128] sm:$0xff]   ;;  %v2914_v51 = vld [vmem:[%s3851_s23 + $0x170] sm:$0xff]  }
  0x2c   : > { %2656 = vmatprep.subr.bf16.mxu1 %v2882_v18  ;;  %v2922_v52 = vld [vmem:[%s3363_s27 + $0x18] ss:$28 sps:$4 sm:$0xff]   ;;  %v2919_v56 = vld [vmem:[%s3363_s27 + $0x10] ss:$28 sps:$4 sm:$0xff]   ;;  %v2931_v1 = vld [vmem:[%s3819_s5] sm:$0xff]   ;;  %p3073_p3 = pnand %p3072_p2, %p3066_p13 }
  0x2d   : > { %2635 = vmatpush3.bf16.msra.mxu0 %v2881_v17  ;;  %v2915_v53 = vld [vmem:[%s3851_s23 + $0x130] sm:$0xff]   ;;  %v2916_v54 = vld [vmem:[%s3851_s23 + $0x178] sm:$0xff]   ;;  %v2932_v2 = vld [vmem:[%s3819_s5 + $0x8] sm:$0xff]  }
  0x2e   : > { %2636 = vmatprep.subr.bf16.mxu0 %v2884_v20  ;;  %v2917_v55 = vld [vmem:[%s3851_s23 + $0x138] sm:$0xff]   ;;  %v2448_v4 = vld [vmem:[%s3816_s2] ss:$0 sm:$0xff] }
  0x2f   : > { %2657 = vmatpush3.bf16.msra.mxu1 %v2883_v19  ;;  %v2930_v0 = vld [vmem:[%s3817_s3 + $0x38] sm:$0xff]  }
  0x30   : > { %2658 = vmatprep.subr.bf16.mxu1 %v2886_v22 }
  0x31   : > { %2637 = vmatpush3.bf16.msra.mxu0 %v2885_v21 }
  0x32   : > { %2638 = vmatprep.subr.bf16.mxu0 %v2888_v24 }
  0x33   : > { %2659 = vmatpush3.bf16.msra.mxu1 %v2887_v23 }
  0x34   : > { %2660 = vmatprep.subr.bf16.mxu1 %v2890_v26 }
  0x35   : > { %2639 = vmatpush3.bf16.msra.mxu0 %v2889_v25 }
  0x36   : > { %2640 = vmatprep.subr.bf16.mxu0 %v2892_v28 }
  0x37   : > { %2661 = vmatpush3.bf16.msra.mxu1 %v2891_v27 }
  0x38   : > { %2662 = vmatprep.subr.bf16.mxu1 %v2894_v30 }
  0x39   : > { %2641 = vmatpush3.bf16.msra.mxu0 %v2893_v29 }
  0x3a   : > { %2670 = vmatprep.subr.bf16.mxu0 %v2899_v34 }
  0x3b   : > { %2663 = vmatpush3.bf16.msra.mxu1 %v2898_v33 }
  0x3c   : > { %1033 = vmatmul.mubr.bf16.vlgmr.msra.gmra.mrb[0].mxu0 %v2895_v31  ;;  %2728 = vmatprep.subr.bf16.mxu1 %v3127_v38 }
  0x3d   : > { %2671 = vmatpush3.bf16.msra.mxu0 %v2903_v37  ;;  %1114 = vmatprep.mubr.bf16.mxu0 %v2921_v50  ;;  %v2933_v37 = vld [vmem:[%s3819_s5 + $0x10] sm:$0xff]   ;;  %v2935_v50 = vld [vmem:[%s3821_s7] sm:$0x3f]  }
  0x3e   : > { %1074 = vmatmul.mubr.bf16.vlgmr.msra.gmra.mrb[0].mxu1 %v2900_v35  ;;  %2672 = vmatprep.subr.bf16.mxu0 %v2904_v39  ;;  %v2934_v39 = vld [vmem:[%s3819_s5 + $0x18] sm:$0xff]  }
  0x3f   : > { %2730 = vmatprep.mubr.msk.bf16.mxu1 %vm3128_vm0, %v3127_v38  ;;  %2729 = vmatpush3.bf16.msra.mxu1 %v2918_v48 }
  0x40   : > { %2734 = vmatprep.subr.bf16.mxu1 %v3127_v38 }
  0x41   : > { %2673 = vmatpush3.bf16.msra.mxu0 %v2905_v40  ;;  %v2506_v40 = vld [vmem:[%s3818_s4] ss:$0 sm:$0xff] }
  0x42   : > { %2674 = vmatprep.subr.bf16.mxu0 %v2906_v41 }
  0x45   : > { %2675 = vmatpush3.bf16.msra.mxu0 %v2907_v42 }
  0x46   : > { %2676 = vmatprep.subr.bf16.mxu0 %v2908_v43  ;;  %2731 = vmatmul.mubr.msk.bf16.vlgmr.msra.gmra.mrb[4].mxu1 %vm996_vm1, %v2922_v52  ;;  %v2515_v52 = vld [vmem:[%s3820_s6] ss:$0 sm:$0xff] }
  0x47   : > { %2750 = vmatprep.mubr.msk.bf16.mxu1 %vm3128_vm0, %v3127_v38  ;;  %2735 = vmatpush3.bf16.msra.mxu1 %v2923_v57 }
  0x48   : > { %2736 = vmatprep.subr.bf16.mxu1 %v3127_v38 }
  0x49   : > { %2677 = vmatpush3.bf16.msra.mxu0 %v2909_v44 }
  0x4a   : > { %2678 = vmatprep.subr.bf16.mxu0 %v2910_v45 }
  0x4b   : > { %2737 = vmatpush3.bf16.msra.mxu1 %v2924_v58 }
  0x4c   : > { %2738 = vmatprep.subr.bf16.mxu1 %v3127_v38 }
  0x4d   : > { %2679 = vmatpush3.bf16.msra.mxu0 %v2911_v46 }
  0x4e   : > { %2680 = vmatprep.subr.bf16.mxu0 %v2912_v47 }
  0x4f   : > { %2739 = vmatpush3.bf16.msra.mxu1 %v2925_v59 }
  0x50   : > { %2740 = vmatprep.subr.bf16.mxu1 %v3127_v38 }
  0x51   : > { %2681 = vmatpush3.bf16.msra.mxu0 %v2913_v49 }
  0x52   : > { %2682 = vmatprep.subr.bf16.mxu0 %v2914_v51  ;;  %v1389_v51 = vsel %vm1387_vm3, %v2935_v50, 0 }
  0x53   : > { %2741 = vmatpush3.bf16.msra.mxu1 %v2926_v60 }
  0x54   : > { %2742 = vmatprep.subr.bf16.mxu1 %v3127_v38 }
  0x55   : > { %2683 = vmatpush3.bf16.msra.mxu0 %v2915_v53 }
  0x56   : > { %2684 = vmatprep.subr.bf16.mxu0 %v2916_v54 }
  0x57   : > { %2743 = vmatpush3.bf16.msra.mxu1 %v2927_v61 }
  0x58   : > { %2744 = vmatprep.subr.bf16.mxu1 %v3127_v38 }
  0x59   : > { %2685 = vmatpush3.bf16.msra.mxu0 %v2917_v55 }
  0x5a   : > { %2754 = vmatprep.subr.bf16.mxu0 %v3127_v38 }
  0x5b   : > { %2745 = vmatpush3.bf16.msra.mxu1 %v2928_v62  ;;  %v3129_v62 = vmov 65535  }
  0x5c   : > { %1115 = vmatmul.mubr.bf16.vlgmr.msra.gmra.mrb[4].mxu0 %v2919_v56  ;;  %2746 = vmatprep.subr.bf16.mxu1 %v3127_v38 }
  0x5d   : > { %2762 = vmatprep.mubr.msk.bf16.mxu0 %vm3128_vm0, %v3127_v38  ;;  %2755 = vmatpush3.bf16.msra.mxu0 %v2931_v1 }
  0x5e   : > { %2756 = vmatprep.subr.bf16.mxu0 %v3127_v38 }
  0x5f   : > { %2747 = vmatpush3.bf16.msra.mxu1 %v2929_v63  ;;  %v1449_v63 = vsel %vm1447_vm5, 4294967295, %v3129_v62  ;;  %v2976_v62 = vld [vmem:[%s3829_s15 + $0x124] ss:$28 sps:$4 sm:$0xff]  }
  0x60   : > { %2748 = vmatprep.subr.bf16.mxu1 %v3127_v38  ;;  %v1450_v1 = vsel %vm1448_vm6, %v1449_v63, 0  ;;  %v2974_v63 = vld [vmem:[%s3829_s15 + $0x120] ss:$28 sps:$4 sm:$0xff]  }
  0x61   : > { %2757 = vmatpush3.bf16.msra.mxu0 %v2932_v2 }
  0x62   : > { %2758 = vmatprep.subr.bf16.mxu0 %v3127_v38 }
  0x63   : > { %2749 = vmatpush3.bf16.msra.mxu1 %v2930_v0  ;;  %v1435_v0 = vld [vmem:[%s3823_s9] sm:$0x3] }
  0x64   : > { %2766 = vmatprep.subr.bf16.mxu1 %v3127_v38  ;;  %v1452_v2 = vand.u32 %v1450_v1, %v1435_v0  ;;  %v2979_v0 = vld [vmem:[%s3829_s15 + $0x154] ss:$28 sps:$4 sm:$0xff]   ;;  %v2982_v1 = vld [vmem:[%s3829_s15 + $0x15c] ss:$28 sps:$4 sm:$0xff]  }
  0x65   : > { %2759 = vmatpush3.bf16.msra.mxu0 %v2933_v37  ;;  %v2959_v37 = vld [vmem:[%s3829_s15 + $0xa8] ss:$28 sps:$4 sm:$0xff]  }
  0x66   : > { %2760 = vmatprep.subr.bf16.mxu0 %v3127_v38 }
  0x69   : > { %2761 = vmatpush3.bf16.msra.mxu0 %v2934_v39  ;;  %v2967_v39 = vld [vmem:[%s3829_s15 + $0xe4] ss:$28 sps:$4 sm:$0xff]  }
  0x6a   : > { %2784 = vmatprep.subr.bf16.mxu0 %v3127_v38 }
 0x10f   : > { %v2642_v3 = vpop.f32.mrb[0].mxu0 }
 0x110   : > { %v2643_v5 = vpop.f32.mrb[1].mxu0 }
 0x111   : > { %v2644_v6 = vadd.f32 %v2643_v5, %v2642_v3  ;;  %v2645_v7 = vpop.f32.mrb[2].mxu0  ;;  %v2664_v8 = vpop.f32.mrb[0].mxu1  ;;  %v2521_v3 = vld [vmem:[%s3822_s8] ss:$0 sm:$0xff] }
 0x112   : > { %v2646_v9 = vpop.f32.mrb[3].mxu0  ;;  %v2665_v12 = vpop.f32.mrb[1].mxu1 }
 0x113   : > { %v1035_v10 = vadd.f32 %v2644_v6, %v2448_v4  ;;  %v2647_v11 = vadd.f32 %v2646_v9, %v2645_v7  ;;  %v2666_v13 = vadd.f32 %v2665_v12, %v2664_v8  ;;  %v2667_v14 = vpop.f32.mrb[2].mxu1 }
 0x114   : > { %v2668_v16 = vpop.f32.mrb[3].mxu1 }
 0x115   : > { %v1038_v15 = vadd.f32 %v2647_v11, %v2448_v4  ;;  %v1076_v17 = vadd.f32 %v2666_v13, %v1035_v10  ;;  %v2669_v18 = vadd.f32 %v2668_v16, %v2667_v14  ;;  %v2936_v13 = vld [vmem:[%s3825_s11] sm:$0x3f]   ;;  %v2938_v16 = vld [vmem:[%s3827_s13 + $0x8] sm:$0xff]  }
 0x116   : > { %v1516_v14 = vsel %vm1387_vm3, %v2936_v13, 0 }
 0x117   : > { %v1079_v19 = vadd.f32 %v2669_v18, %v1038_v15  ;;  %v2937_v15 = vld [vmem:[%s3827_s13] sm:$0xff]  }
 0x119   : > { %v1157_v20 = vpop.f32.mrb[4].mxu1 }
 0x11a   : > { %v2732_v21 = vpop.f32.mrb[5].mxu1 }
 0x11b   : > { %v1160_v22 = vpop.f32.mrb[6].mxu1 }
 0x11c   : > { %v2733_v23 = vpop.f32.mrb[7].mxu1 }
 0x12f   : > { %v2686_v24 = vpop.f32.mrb[4].mxu0 }
 0x130   : > { %v2687_v25 = vpop.f32.mrb[5].mxu0 }
 0x131   : > { %v2688_v26 = vadd.f32 %v2687_v25, %v2686_v24  ;;  %v2689_v27 = vpop.f32.mrb[6].mxu0 }
 0x132   : > { %v2690_v28 = vpop.f32.mrb[7].mxu0 }
 0x133   : > { %v1117_v29 = vadd.f32 %v2688_v26, %v1076_v17  ;;  %v2691_v30 = vadd.f32 %v2690_v28, %v2689_v27  ;;  %v2524_v17 = vld [vmem:[%s3824_s10] ss:$0 sm:$0xff]  ;;  %v2939_v27 = vld [vmem:[%s3827_s13 + $0x10] sm:$0xff]   ;;  %v2940_v28 = vld [vmem:[%s3827_s13 + $0x18] sm:$0xff]  }
 0x135   : > { %v1158_v31 = vadd.f32 %v1157_v20, %v1117_v29  ;;  %v1120_v32 = vadd.f32 %v2691_v30, %v1079_v19  ;;  %v2941_v29 = vld [vmem:[%s3829_s15] ss:$28 sps:$4 sm:$0xff]  }
 0x136   : > { %v2943_v30 = vld [vmem:[%s3829_s15 + $0x4] ss:$28 sps:$4 sm:$0xff]  }
 0x137   : > { %v1161_v33 = vadd.f32 %v1160_v22, %v1120_v32  ;;  %v1164_v34 = vmax.f32 %v1158_v31, 0.0  ;;  %v2946_v31 = vld [vmem:[%s3829_s15 + $0xc] ss:$28 sps:$4 sm:$0xff]   ;;  %v2949_v32 = vld [vmem:[%s3829_s15 + $0x3c] ss:$28 sps:$4 sm:$0xff]  }
 0x139   : > { %v1165_v35 = vmax.f32 %v1161_v33, 0.0  ;;  %v2947_v33 = vld [vmem:[%s3829_s15 + $0x38] ss:$28 sps:$4 sm:$0xff]  }
 0x13b   : > { %v1166_v36 = vpack.c.bf16 %v1165_v35, %v1164_v34  ;;  %v2955_v34 = vld [vmem:[%s3829_s15 + $0x74] ss:$28 sps:$4 sm:$0xff]  }
 0x13c   : > { %v2953_v35 = vld [vmem:[%s3829_s15 + $0x70] ss:$28 sps:$4 sm:$0xff]  }
 0x13d   : > { %2751 = vmatmul.mubr.bf16.vlgmr.msra.gmra.mrb[8].mxu1 %v1166_v36  ;;  %v2961_v36 = vld [vmem:[%s3829_s15 + $0xac] ss:$28 sps:$4 sm:$0xff]  }
 0x13e   : > { %2768 = vmatprep.mubr.msk.bf16.mxu1 %vm3128_vm0, %v3127_v38  ;;  %2767 = vmatpush3.bf16.msra.mxu1 %v1389_v51 }
 0x13f   : > { %2772 = vmatprep.subr.bf16.mxu1 %v3127_v38 }
 0x210   : > { %v1272_v41 = vpop.f32.mrb[8].mxu1 }
 0x211   : > { %v1273_v42 = vadd.f32 %v2506_v40, %v1272_v41  ;;  %v2752_v43 = vpop.f32.mrb[9].mxu1  ;;  %v2973_v41 = vld [vmem:[%s3829_s15 + $0x11c] ss:$28 sps:$4 sm:$0xff]  }
 0x212   : > { %v1275_v44 = vpop.f32.mrb[10].mxu1  ;;  %v2526_v43 = vld [vmem:[%s3826_s12] ss:$0 sm:$0xff] }
 0x213   : > { %v1276_v45 = vadd.f32 %v2506_v40, %v1275_v44  ;;  %v2753_v46 = vpop.f32.mrb[11].mxu1  ;;  %v1279_v47 = vmax.f32 %v1273_v42, 0.0  ;;  %v2965_v40 = vld [vmem:[%s3829_s15 + $0xe0] ss:$28 sps:$4 sm:$0xff]   ;;  %v2971_v42 = vld [vmem:[%s3829_s15 + $0x118] ss:$28 sps:$4 sm:$0xff]  }
 0x215   : > { %v1280_v48 = vmax.f32 %v1276_v45, 0.0 }
 0x217   : > { %v1281_v49 = vpack.c.bf16 %v1280_v48, %v1279_v47 }
 0x219   : > { %2763 = vmatmul.mubr.msk.bf16.vlgmr.msra.gmra.mrb[8].mxu0 %vm1321_vm2, %v1281_v49 }
 0x21a   : > { %2792 = vmatprep.mubr.msk.bf16.mxu0 %vm3128_vm0, %v3127_v38  ;;  %2785 = vmatpush3.bf16.msra.mxu0 %v2937_v15 }
 0x21b   : > { %2786 = vmatprep.subr.bf16.mxu0 %v3127_v38 }
 0x21e   : > { %2787 = vmatpush3.bf16.msra.mxu0 %v2938_v16 }
 0x21f   : > { %2788 = vmatprep.subr.bf16.mxu0 %v3127_v38 }
 0x222   : > { %2789 = vmatpush3.bf16.msra.mxu0 %v2939_v27  ;;  %v3000_v27 = vld [vmem:[%s3829_s15 + $0x88] ss:$28 sps:$4 sm:$0xff]  }
 0x223   : > { %2790 = vmatprep.subr.bf16.mxu0 %v3127_v38 }
 0x226   : > { %2791 = vmatpush3.bf16.msra.mxu0 %v2940_v28  ;;  %v3003_v28 = vld [vmem:[%s3829_s15 + $0xbc] ss:$28 sps:$4 sm:$0xff]  }
 0x227   : > { %2080 = vmatprep.subr.bf16.mxu0 %v2946_v31  ;;  %v3007_v31 = vld [vmem:[%s3829_s15 + $0xf4] ss:$28 sps:$4 sm:$0xff]  }
 0x2ec   : > { %v1359_v53 = vpop.f32.mrb[8].mxu0 }
 0x2ed   : > { %v1360_v54 = vadd.f32 %v2515_v52, %v1359_v53  ;;  %v2764_v55 = vpop.f32.mrb[9].mxu0 }
 0x2ee   : > { %v1362_v56 = vpop.f32.mrb[10].mxu0  ;;  %v2950_v55 = vld [vmem:[%s3829_s15 + $0x40] ss:$28 sps:$4 sm:$0xff]  }
 0x2ef   : > { %v1363_v57 = vadd.f32 %v2515_v52, %v1362_v56  ;;  %v2765_v58 = vpop.f32.mrb[11].mxu0  ;;  %v1366_v59 = vmax.f32 %v1360_v54, 0.0  ;;  %v2944_v52 = vld [vmem:[%s3829_s15 + $0x8] ss:$28 sps:$4 sm:$0xff]   ;;  %v2958_v56 = vld [vmem:[%s3829_s15 + $0x7c] ss:$28 sps:$4 sm:$0xff]  }
 0x2f0   : > { %v2952_v54 = vld [vmem:[%s3829_s15 + $0x44] ss:$28 sps:$4 sm:$0xff]   ;;  %v2964_v58 = vld [vmem:[%s3829_s15 + $0xb4] ss:$28 sps:$4 sm:$0xff]  }
 0x2f1   : > { %v1367_v60 = vmax.f32 %v1363_v57, 0.0  ;;  %v2956_v57 = vld [vmem:[%s3829_s15 + $0x78] ss:$28 sps:$4 sm:$0xff]  }
 0x2f3   : > { %v1368_v61 = vpack.c.bf16 %v1367_v60, %v1366_v59  ;;  %v2962_v59 = vld [vmem:[%s3829_s15 + $0xb0] ss:$28 sps:$4 sm:$0xff]  }
 0x2f4   : > { %v2970_v60 = vld [vmem:[%s3829_s15 + $0xec] ss:$28 sps:$4 sm:$0xff]  }
 0x2f5   : > { %2769 = vmatmul.mubr.msk.bf16.vlgmr.msra.gmra.mrb[12].mxu1 %vm1383_vm4, %v1368_v61  ;;  %v2968_v61 = vld [vmem:[%s3829_s15 + $0xe8] ss:$28 sps:$4 sm:$0xff]  }
 0x2f6   : > { %2774 = vmatprep.mubr.msk.bf16.mxu1 %vm3128_vm0, %v3127_v38  ;;  %2773 = vmatpush3.bf16.msra.mxu1 %v1452_v2  ;;  %v2977_v2 = vld [vmem:[%s3829_s15 + $0x150] ss:$28 sps:$4 sm:$0xff]  }
 0x2f7   : > { %2778 = vmatprep.subr.bf16.mxu1 %v3127_v38 }
 0x3c8   : > { %v1425_v4 = vpop.f32.mrb[12].mxu1 }
 0x3c9   : > { %v1426_v5 = vadd.f32 %v2521_v3, %v1425_v4  ;;  %v2770_v6 = vpop.f32.mrb[13].mxu1  ;;  %v2985_v4 = vld [vmem:[%s3829_s15 + $0x18c] ss:$28 sps:$4 sm:$0xff]  }
 0x3ca   : > { %v1428_v7 = vpop.f32.mrb[14].mxu1  ;;  %v2983_v6 = vld [vmem:[%s3829_s15 + $0x188] ss:$28 sps:$4 sm:$0xff]  }
 0x3cb   : > { %v1429_v8 = vadd.f32 %v2521_v3, %v1428_v7  ;;  %v2771_v9 = vpop.f32.mrb[15].mxu1  ;;  %v1432_v10 = vmax.f32 %v1426_v5, 0.0  ;;  %v2980_v3 = vld [vmem:[%s3829_s15 + $0x158] ss:$28 sps:$4 sm:$0xff]   ;;  %v2986_v7 = vld [vmem:[%s3829_s15 + $0x190] ss:$28 sps:$4 sm:$0xff]  }
 0x3cc   : > { %v2988_v5 = vld [vmem:[%s3829_s15 + $0x194] ss:$28 sps:$4 sm:$0xff]   ;;  %v3130_v9 = vmov 0  }
 0x3cd   : > { %v1433_v11 = vmax.f32 %v1429_v8, 0.0  ;;  %v2991_v8 = vld [vmem:[%s3829_s15 + $0x14] ss:$28 sps:$4 sm:$0xff]  }
 0x3cf   : > { %v1434_v12 = vpack.c.bf16 %v1433_v11, %v1432_v10  ;;  %v2529_v10 = vld [vmem:[%s3828_s14] ss:$0 sm:$0xff] }
 0x3d1   : > { %2775 = vmatmul.mubr.msk.bf16.vlgmr.msra.gmra.mrb[16].mxu1 %vm1443_vm7, %v1434_v12 }
 0x3d2   : > { %2780 = vmatprep.mubr.msk.bf16.mxu1 %vm3128_vm0, %v3127_v38  ;;  %2779 = vmatpush3.bf16.msra.mxu1 %v1516_v14 }
 0x3d3   : > { %2037 = vmatprep.subr.bf16.mxu1 %v2943_v30  ;;  %v3004_v30 = vld [vmem:[%s3829_s15 + $0xc0] ss:$28 sps:$4 sm:$0xff]  }
 0x4a4   : > { %v1488_v18 = vpop.f32.mrb[16].mxu1 }
 0x4a5   : > { %v1489_v19 = vadd.f32 %v2524_v17, %v1488_v18  ;;  %v2776_v20 = vpop.f32.mrb[17].mxu1 }
 0x4a6   : > { %v1491_v21 = vpop.f32.mrb[18].mxu1  ;;  %v2992_v20 = vld [vmem:[%s3829_s15 + $0x18] ss:$28 sps:$4 sm:$0xff]  }
 0x4a7   : > { %v1492_v22 = vadd.f32 %v2524_v17, %v1491_v21  ;;  %v2777_v23 = vpop.f32.mrb[19].mxu1  ;;  %v1495_v24 = vmax.f32 %v1489_v19, 0.0  ;;  %v2989_v19 = vld [vmem:[%s3829_s15 + $0x10] ss:$28 sps:$4 sm:$0xff]  }
 0x4a8   : > { %v2993_v23 = vld [vmem:[%s3829_s15 + $0x48] ss:$28 sps:$4 sm:$0xff]  }
 0x4a9   : > { %v1496_v25 = vmax.f32 %v1492_v22, 0.0  ;;  %v2995_v22 = vld [vmem:[%s3829_s15 + $0x4c] ss:$28 sps:$4 sm:$0xff]  }
 0x4ab   : > { %v1497_v26 = vpack.c.bf16 %v1496_v25, %v1495_v24  ;;  %v2996_v24 = vld [vmem:[%s3829_s15 + $0x50] ss:$28 sps:$4 sm:$0xff]   ;;  %v2999_v25 = vld [vmem:[%s3829_s15 + $0x84] ss:$28 sps:$4 sm:$0xff]  }
 0x4ad   : > { %2781 = vmatmul.mubr.msk.bf16.vlgmr.msra.gmra.mrb[20].mxu1 %vm1383_vm4, %v1497_v26  ;;  %v2997_v26 = vld [vmem:[%s3829_s15 + $0x80] ss:$28 sps:$4 sm:$0xff]  }
 0x4ae   : > { %2038 = vmatpush1.bf16.msra.mxu1 %v2941_v29  ;;  %2069 = vmatprep.mubr.bf16.mxu1 %v3130_v9  ;;  %v3001_v29 = vld [vmem:[%s3829_s15 + $0xb8] ss:$28 sps:$4 sm:$0xff]  }
 0x4af   : > { %2039 = vmatprep.subr.bf16.mxu1 %v2949_v32  ;;  %v3005_v32 = vld [vmem:[%s3829_s15 + $0xf0] ss:$28 sps:$4 sm:$0xff]  }
 0x4b2   : > { %2040 = vmatpush1.bf16.msra.mxu1 %v2947_v33  ;;  %v3008_v33 = vld [vmem:[%s3829_s15 + $0xf8] ss:$28 sps:$4 sm:$0xff]  }
 0x4b3   : > { %2041 = vmatprep.subr.bf16.mxu1 %v2955_v34  ;;  %v3011_v34 = vld [vmem:[%s3829_s15 + $0x12c] ss:$28 sps:$4 sm:$0xff]  }
 0x4b6   : > { %2042 = vmatpush1.bf16.msra.mxu1 %v2953_v35  ;;  %v3009_v35 = vld [vmem:[%s3829_s15 + $0x128] ss:$28 sps:$4 sm:$0xff]  }
 0x4b7   : > { %2043 = vmatprep.subr.bf16.mxu1 %v2961_v36  ;;  %v3012_v36 = vld [vmem:[%s3829_s15 + $0x130] ss:$28 sps:$4 sm:$0xff]  }
 0x4ba   : > { %2044 = vmatpush1.bf16.msra.mxu1 %v2959_v37  ;;  %v3015_v37 = vld [vmem:[%s3829_s15 + $0x164] ss:$28 sps:$4 sm:$0xff]  }
 0x4bb   : > { %2045 = vmatprep.subr.bf16.mxu1 %v2967_v39  ;;  %v3013_v39 = vld [vmem:[%s3829_s15 + $0x160] ss:$28 sps:$4 sm:$0xff]  }
 0x4be   : > { %2046 = vmatpush1.bf16.msra.mxu1 %v2965_v40  ;;  %v3016_v40 = vld [vmem:[%s3829_s15 + $0x168] ss:$28 sps:$4 sm:$0xff]  }
 0x4bf   : > { %2047 = vmatprep.subr.bf16.mxu1 %v2973_v41  ;;  %v3019_v41 = vld [vmem:[%s3829_s15 + $0x19c] ss:$28 sps:$4 sm:$0xff]  }
 0x4c2   : > { %2048 = vmatpush1.bf16.msra.mxu1 %v2971_v42  ;;  %v3017_v42 = vld [vmem:[%s3829_s15 + $0x198] ss:$28 sps:$4 sm:$0xff]  }
 0x4c3   : > { %2049 = vmatprep.subr.bf16.mxu1 %v2979_v0 }
 0x4c6   : > { %2050 = vmatpush1.bf16.msra.mxu1 %v2977_v2 }
 0x4c7   : > { %2051 = vmatprep.subr.bf16.mxu1 %v2985_v4 }
 0x4ca   : > { %2052 = vmatpush1.bf16.msra.mxu1 %v2983_v6 }
 0x4cb   : > { %2123 = vmatprep.subr.bf16.mxu1 %v2991_v8 }
 0x580   : > { %v1552_v44 = vpop.f32.mrb[20].mxu1 }
 0x581   : > { %v1553_v45 = vadd.f32 %v2526_v43, %v1552_v44  ;;  %v2782_v46 = vpop.f32.mrb[21].mxu1  ;;  %v1714_v44 = vlaneseq }
 0x582   : > { %v1555_v47 = vpop.f32.mrb[22].mxu1 }
 0x583   : > { %v1556_v48 = vadd.f32 %v2526_v43, %v1555_v47  ;;  %v2783_v49 = vpop.f32.mrb[23].mxu1  ;;  %v1559_v50 = vmax.f32 %v1553_v45, 0.0  ;;  %v3020_v43 = vld [vmem:[%s3829_s15 + $0x1a0] ss:$28 sps:$4 sm:$0xff]   ;;  %v3728_v45 = vshrl.u32 %v1714_v44, 7 }
 0x585   : > { %v1560_v51 = vmax.f32 %v1556_v48, 0.0  ;;  %v1716_v46 = vsub.s32 0, %v3728_v45  ;;  %v1724_v47 = vsub.s32 2, %v3728_v45  ;;  %v3735_v48 = vld [vmem:[%s3830_s16] sm:$0x7f]  ;;  %v1720_v49 = vsub.s32 1, %v3728_v45 }
 0x587   : > { %v1561_v53 = vpack.c.bf16 %v1560_v51, %v1559_v50  ;;  %v1717_v50 = vrot.slane %v3735_v48, %v1716_v46  ;;  %v1725_v51 = vrot.slane %v3735_v48, %v1724_v47 }
 0x589   : > { %2793 = vmatmul.mubr.msk.bf16.vlgmr.msra.gmra.mrb[12].mxu0 %vm1321_vm2, %v1561_v53 }
 0x58a   : > { %2081 = vmatpush1.bf16.msra.mxu0 %v2944_v52  ;;  %2112 = vmatprep.mubr.bf16.mxu0 %v3130_v9  ;;  %v1721_v52 = vrot.slane %v3735_v48, %v1720_v49 }
 0x58b   : > { %2082 = vmatprep.subr.bf16.mxu0 %v2952_v54 }
 0x58e   : > { %2083 = vmatpush1.bf16.msra.mxu0 %v2950_v55 }
 0x58f   : > { %2084 = vmatprep.subr.bf16.mxu0 %v2958_v56 }
 0x592   : > { %2085 = vmatpush1.bf16.msra.mxu0 %v2956_v57 }
 0x593   : > { %2086 = vmatprep.subr.bf16.mxu0 %v2964_v58 }
 0x596   : > { %2087 = vmatpush1.bf16.msra.mxu0 %v2962_v59 }
 0x597   : > { %2088 = vmatprep.subr.bf16.mxu0 %v2970_v60 }
 0x59a   : > { %2089 = vmatpush1.bf16.msra.mxu0 %v2968_v61 }
 0x59b   : > { %2090 = vmatprep.subr.bf16.mxu0 %v2976_v62 }
 0x59e   : > { %2091 = vmatpush1.bf16.msra.mxu0 %v2974_v63 }
 0x59f   : > { %2092 = vmatprep.subr.bf16.mxu0 %v2982_v1 }
 0x5a2   : > { %2093 = vmatpush1.bf16.msra.mxu0 %v2980_v3 }
 0x5a3   : > { %2094 = vmatprep.subr.bf16.mxu0 %v2988_v5 }
 0x5a6   : > { %2095 = vmatpush1.bf16.msra.mxu0 %v2986_v7 }
 0x5a7   : > { %2796 = vmatprep.subr.bf16.mxu0 %v3127_v38 }
 0x65c   : > { %v1638_v11 = vpop.f32.mrb[12].mxu0 }
 0x65d   : > { %v1639_v12 = vadd.f32 %v2529_v10, %v1638_v11  ;;  %v2794_v13 = vpop.f32.mrb[13].mxu0 }
 0x65e   : > { %v1641_v14 = vpop.f32.mrb[14].mxu0 }
 0x65f   : > { %v1642_v15 = vadd.f32 %v2529_v10, %v1641_v14  ;;  %v2795_v16 = vpop.f32.mrb[15].mxu0  ;;  %v1645_v17 = vmax.f32 %v1639_v12, 0.0 }
 0x661   : > { %v1646_v18 = vmax.f32 %v1642_v15, 0.0 }
 0x663   : > { %v1647_v21 = vpack.c.bf16 %v1646_v18, %v1645_v17 }
 0x665   : > { %2070 = vmatmul.mubr.bf16.vlgmr.msra.gmra.mrb[24].mxu1 %v1647_v21  ;;  %2113 = vmatmul.mubr.bf16.vlgmr.msra.gmra.mrb[16].mxu0 %v1647_v21 }
 0x666   : > { %2124 = vmatpush1.bf16.msra.mxu1 %v2989_v19  ;;  %2797 = vmatpush3.bf16.msra.mxu0 %v2992_v20 }
 0x667   : > { %2125 = vmatprep.subr.bf16.mxu1 %v2995_v22  ;;  %2798 = vmatprep.subr.bf16.mxu0 %v3127_v38 }
 0x668   : > { %2155 = vmatprep.mubr.bf16.mxu1 %v3130_v9  ;;  %2812 = vmatprep.mubr.msk.bf16.mxu0 %vm3128_vm0, %v3127_v38 }
 0x66a   : > { %2126 = vmatpush1.bf16.msra.mxu1 %v2993_v23  ;;  %2799 = vmatpush3.bf16.msra.mxu0 %v2996_v24 }
 0x66b   : > { %2127 = vmatprep.subr.bf16.mxu1 %v2999_v25  ;;  %2800 = vmatprep.subr.bf16.mxu0 %v3127_v38 }
 0x66e   : > { %2128 = vmatpush1.bf16.msra.mxu1 %v2997_v26  ;;  %2801 = vmatpush3.bf16.msra.mxu0 %v3000_v27 }
 0x66f   : > { %2129 = vmatprep.subr.bf16.mxu1 %v3003_v28  ;;  %2802 = vmatprep.subr.bf16.mxu0 %v3127_v38 }
 0x672   : > { %2130 = vmatpush1.bf16.msra.mxu1 %v3001_v29  ;;  %2803 = vmatpush3.bf16.msra.mxu0 %v3004_v30  ;;  %v1732_v30 = vsub.s32 4, %v3728_v45 }
 0x673   : > { %2131 = vmatprep.subr.bf16.mxu1 %v3007_v31  ;;  %2804 = vmatprep.subr.bf16.mxu0 %v3127_v38 }
 0x674   : > { %v1733_v49 = vrot.slane %v3735_v48, %v1732_v30 }
 0x676   : > { %2132 = vmatpush1.bf16.msra.mxu1 %v3005_v32  ;;  %2805 = vmatpush3.bf16.msra.mxu0 %v3008_v33 }
 0x677   : > { %2133 = vmatprep.subr.bf16.mxu1 %v3011_v34  ;;  %2806 = vmatprep.subr.bf16.mxu0 %v3127_v38  ;;  %v1740_v34 = vsub.s32 6, %v3728_v45 }
 0x67a   : > { %2134 = vmatpush1.bf16.msra.mxu1 %v3009_v35  ;;  %2807 = vmatpush3.bf16.msra.mxu0 %v3012_v36  ;;  %v1736_v35 = vsub.s32 5, %v3728_v45 }
 0x67b   : > { %2135 = vmatprep.subr.bf16.mxu1 %v3015_v37  ;;  %2808 = vmatprep.subr.bf16.mxu0 %v3127_v38 }
 0x67e   : > { %2136 = vmatpush1.bf16.msra.mxu1 %v3013_v39  ;;  %2809 = vmatpush3.bf16.msra.mxu0 %v3016_v40 }
 0x67f   : > { %2137 = vmatprep.subr.bf16.mxu1 %v3019_v41  ;;  %2810 = vmatprep.subr.bf16.mxu0 %v3127_v38  ;;  %v1728_v38 = vsub.s32 3, %v3728_v45 }
 0x681   : > { %v1729_v53 = vrot.slane %v3735_v48, %v1728_v38 }
 0x682   : > { %2138 = vmatpush1.bf16.msra.mxu1 %v3017_v42  ;;  %2811 = vmatpush3.bf16.msra.mxu0 %v3020_v43 }
 0x685   : > { %2156 = vmatmul.mubr.bf16.vlgmr.msra.gmra.mrb[28].mxu1 %v1647_v21  ;;  %2813 = vmatmul.mubr.bf16.vlgmr.msra.gmra.mrb[20].mxu0 %v1647_v21 }
 0x738   : > { %v2071_v54 = vpop.f32.mrb[24].mxu1  ;;  %v2114_v55 = vpop.f32.mrb[16].mxu0 }
 0x739   : > { %v2072_v56 = vadd.f32 %v2071_v54, %v1717_v50  ;;  %v2115_v57 = vadd.f32 %v2114_v55, %v1725_v51  ;;  %v2073_v58 = vpop.f32.mrb[25].mxu1  ;;  %v2116_v59 = vpop.f32.mrb[17].mxu0 }
 0x73a   : > { %v2074_v60 = vadd.f32 %v2073_v58, %v1721_v52  ;;  %v2117_v61 = vadd.f32 %v2116_v59, %v1729_v53  ;;  %v2075_v62 = vpop.f32.mrb[26].mxu1  ;;  %v2118_v63 = vpop.f32.mrb[18].mxu0 }
 0x73b   : > { %v2076_v0 = vadd.f32 %v2075_v62, %v1717_v50  ;;  %v2119_v1 = vadd.f32 %v2118_v63, %v1725_v51  ;;  %v2077_v2 = vpop.f32.mrb[27].mxu1  ;;  %v2120_v3 = vpop.f32.mrb[19].mxu0  ;;  %v2591_v6 = vclamps-f32 %v2072_v56, 30.0  ;;  %v2593_v7 = vclamps-f32 %v2115_v57, 30.0 }
 0x73c   : > { %v2078_v4 = vadd.f32 %v2077_v2, %v1721_v52  ;;  %v2121_v5 = vadd.f32 %v2120_v3, %v1729_v53  ;;  %v2592_v10 = vclamps-f32 %v2074_v60, 30.0  ;;  %v2594_v11 = vclamps-f32 %v2117_v61, 30.0 }
 0x73d   : > { %v2598_v8 = vclamps-f32 %v2076_v0, 30.0  ;;  %v2600_v9 = vclamps-f32 %v2119_v1, 30.0  ;;  %v1741_v50 = vrot.slane %v3735_v48, %v1740_v34  ;;  %v1737_v51 = vrot.slane %v3735_v48, %v1736_v35 }
 0x73e   : > { %v2599_v12 = vclamps-f32 %v2078_v4, 30.0  ;;  %v2601_v13 = vclamps-f32 %v2121_v5, 30.0 }
 0x73f   : > { %v2235_v14 = vpack.c.bf16 %v2598_v8, %v2591_v6  ;;  %v2237_v15 = vpack.c.bf16 %v2600_v9, %v2593_v7 }
 0x740   : > { %v2236_v16 = vpack.c.bf16 %v2599_v12, %v2592_v10  ;;  %v2238_v17 = vpack.c.bf16 %v2601_v13, %v2594_v11 }
 0x741   : > { %v2242_v18 = vsub.bf16 0, %v2235_v14  ;;  %v2244_v19 = vsub.bf16 0, %v2237_v15 }
 0x742   : > { %v2243_v20 = vsub.bf16 0, %v2236_v16  ;;  %v2245_v21 = vsub.bf16 0, %v2238_v17 }
 0x743   : > { %v2250_v22 = vmul.bf16 1069105081, %v2242_v18  ;;  %v2256_v23 = vmul.bf16 1069105081, %v2244_v19 }
 0x744   : > { %v2253_v24 = vmul.bf16 1069105081, %v2243_v20  ;;  %v2259_v25 = vmul.bf16 1069105081, %v2245_v21 }
 0x745   : > { %3021 = vpow.bf16 %v2250_v22 }
 0x746   : > { %3023 = vpow.bf16 %v2256_v23 }
 0x747   : > { %3025 = vpow.bf16 %v2253_v24 }
 0x748   : > { %3027 = vpow.bf16 %v2259_v25 }
 0x750   : > { %v3022_v26 = vpop.eup %3021 }
 0x751   : > { %v3024_v27 = vpop.eup %3023  ;;  %v2270_v28 = vunpack.c.l.bf16 %v3022_v26  ;;  %v2277_v29 = vunpack.c.h.bf16 %v3022_v26 }
 0x752   : > { %v3026_v31 = vpop.eup %3025  ;;  %v2272_v32 = vunpack.c.l.bf16 %v3024_v27  ;;  %v2279_v33 = vunpack.c.h.bf16 %v3024_v27 }
 0x753   : > { %v3028_v36 = vpop.eup %3027  ;;  %v2284_v37 = vadd.f32 1.0, %v2270_v28  ;;  %v2291_v39 = vadd.f32 1.0, %v2277_v29  ;;  %v2271_v40 = vunpack.c.l.bf16 %v3026_v31  ;;  %v2278_v41 = vunpack.c.h.bf16 %v3026_v31 }
 0x754   : > { %v2286_v42 = vadd.f32 1.0, %v2272_v32  ;;  %v2293_v43 = vadd.f32 1.0, %v2279_v33  ;;  %v2273_v44 = vunpack.c.l.bf16 %v3028_v36  ;;  %v2280_v46 = vunpack.c.h.bf16 %v3028_v36 }
 0x755   : > { %3029 = vrcp.f32 %v2284_v37  ;;  %v2285_v47 = vadd.f32 1.0, %v2271_v40  ;;  %v2292_v38 = vadd.f32 1.0, %v2278_v41 }
 0x756   : > { %3031 = vrcp.f32 %v2291_v39  ;;  %v2287_v45 = vadd.f32 1.0, %v2273_v44  ;;  %v2294_v52 = vadd.f32 1.0, %v2280_v46 }
 0x757   : > { %3033 = vrcp.f32 %v2286_v42 }
 0x758   : > { %3035 = vrcp.f32 %v2293_v43  ;;  %v2157_v53 = vpop.f32.mrb[28].mxu1  ;;  %v2200_v54 = vpop.f32.mrb[20].mxu0 }
 0x759   : > { %3037 = vrcp.f32 %v2285_v47  ;;  %v2158_v55 = vadd.f32 %v2157_v53, %v1733_v49  ;;  %v2159_v56 = vpop.f32.mrb[29].mxu1  ;;  %v2814_v57 = vpop.f32.mrb[21].mxu0  ;;  %v2201_v58 = vadd.f32 %v2200_v54, %v1741_v50 }
 0x75a   : > { %3039 = vrcp.f32 %v2292_v38  ;;  %v2160_v59 = vadd.f32 %v2159_v56, %v1737_v51  ;;  %v2161_v60 = vpop.f32.mrb[30].mxu1  ;;  %v2203_v61 = vpop.f32.mrb[22].mxu0 }
 0x75b   : > { %3041 = vrcp.f32 %v2287_v45  ;;  %v2162_v62 = vadd.f32 %v2161_v60, %v1733_v49  ;;  %v2163_v48 = vpop.f32.mrb[31].mxu1  ;;  %v2815_v63 = vpop.f32.mrb[23].mxu0  ;;  %v2204_v0 = vadd.f32 %v2203_v61, %v1741_v50  ;;  %v2595_v2 = vclamps-f32 %v2158_v55, 30.0 }
 0x75c   : > { %3043 = vrcp.f32 %v2294_v52  ;;  %v2164_v1 = vadd.f32 %v2163_v48, %v1737_v51  ;;  %v2597_v4 = vclamps-f32 %v2201_v58, 30.0  ;;  %v2596_v5 = vclamps-f32 %v2160_v59, 30.0 }
 0x75d   : > { %v2602_v3 = vclamps-f32 %v2162_v62, 30.0  ;;  %v2604_v6 = vclamps-f32 %v2204_v0, 30.0 }
 0x75e   : > { %v2603_v7 = vclamps-f32 %v2164_v1, 30.0 }
 0x75f   : > { %v3030_v8 = vpop.eup %3029  ;;  %v2239_v9 = vpack.c.bf16 %v2602_v3, %v2595_v2  ;;  %v2241_v11 = vpack.c.bf16 %v2604_v6, %v2597_v4 }
 0x760   : > { %v3032_v10 = vpop.eup %3031  ;;  %v2240_v12 = vpack.c.bf16 %v2603_v7, %v2596_v5 }
 0x761   : > { %v3034_v13 = vpop.eup %3033  ;;  %v2246_v14 = vsub.bf16 0, %v2239_v9  ;;  %v2248_v16 = vsub.bf16 0, %v2241_v11 }
 0x762   : > { %v3036_v15 = vpop.eup %3035  ;;  %v2247_v17 = vsub.bf16 0, %v2240_v12 }
 0x763   : > { %v3038_v18 = vpop.eup %3037  ;;  %v2262_v19 = vmul.bf16 1069105081, %v2246_v14  ;;  %v2268_v22 = vmul.bf16 1069105081, %v2248_v16 }
 0x764   : > { %v3040_v20 = vpop.eup %3039  ;;  %v2618_v21 = vpack.c.bf16 %v3038_v18, %v3030_v8  ;;  %v2265_v23 = vmul.bf16 1069105081, %v2247_v17 }
 0x765   : > { %v3042_v24 = vpop.eup %3041  ;;  %v2622_v25 = vpack.c.bf16 %v3040_v20, %v3032_v10  ;;  %3045 = vpow.bf16 %v2262_v19 }
 0x766   : > { %v3044_v26 = vpop.eup %3043  ;;  %2356 = vst [vmem:[%s3752_s21] sm:$0xff] %v2618_v21  ;;  %v2619_v27 = vpack.c.bf16 %v3042_v24, %v3034_v13  ;;  %3047 = vpow.bf16 %v2268_v22 }
 0x767   : > { %2361 = vst [vmem:[%s3752_s21 + $0x1c] sm:$0xff] %v2622_v25  ;;  %v2623_v28 = vpack.c.bf16 %v3044_v26, %v3036_v15  ;;  %3049 = vpow.bf16 %v2265_v23 }
 0x768   : > { %2357 = vst [vmem:[%s3752_s21 + $0x8] sm:$0xff] %v2619_v27 }
 0x769   : > { %2362 = vst [vmem:[%s3752_s21 + $0x24] sm:$0xff] %v2623_v28 }
 0x770   : > { %v3046_v29 = vpop.eup %3045 }
 0x771   : > { %v3048_v30 = vpop.eup %3047  ;;  %v2274_v31 = vunpack.c.l.bf16 %v3046_v29  ;;  %v2281_v32 = vunpack.c.h.bf16 %v3046_v29 }
 0x772   : > { %v3050_v33 = vpop.eup %3049  ;;  %v2276_v34 = vunpack.c.l.bf16 %v3048_v30  ;;  %v2283_v35 = vunpack.c.h.bf16 %v3048_v30 }
 0x773   : > { %v2288_v36 = vadd.f32 1.0, %v2274_v31  ;;  %v2295_v37 = vadd.f32 1.0, %v2281_v32  ;;  %v2275_v39 = vunpack.c.l.bf16 %v3050_v33  ;;  %v2282_v40 = vunpack.c.h.bf16 %v3050_v33 }
 0x774   : > { %v2290_v41 = vadd.f32 1.0, %v2276_v34  ;;  %v2297_v42 = vadd.f32 1.0, %v2283_v35 }
 0x775   : > { %3051 = vrcp.f32 %v2288_v36  ;;  %v2289_v43 = vadd.f32 1.0, %v2275_v39  ;;  %v2296_v44 = vadd.f32 1.0, %v2282_v40 }
 0x776   : > { %3053 = vrcp.f32 %v2295_v37 }
 0x777   : > { %3055 = vrcp.f32 %v2290_v41 }
 0x778   : > { %3057 = vrcp.f32 %v2297_v42 }
 0x779   : > { %3059 = vrcp.f32 %v2289_v43 }
 0x77a   : > { %3061 = vrcp.f32 %v2296_v44 }
 0x77f   : > { %v3052_v46 = vpop.eup %3051 }
 0x780   : > { %v3054_v47 = vpop.eup %3053 }
 0x781   : > { %v3056_v49 = vpop.eup %3055 }
 0x782   : > { %v3058_v38 = vpop.eup %3057  ;;  %v2621_v50 = vpack.c.bf16 %v3056_v49, %v3056_v49 }
 0x783   : > { %v3060_v51 = vpop.eup %3059  ;;  %v2625_v45 = vpack.c.bf16 %v3058_v38, %v3058_v38 }
 0x784   : > { %v3062_v52 = vpop.eup %3061  ;;  %2360 = vst.msk [vmem:[%s3752_s21 + $0x18] sm:$0xf] %vm2359_vm8, %v2621_v50  ;;  %v2620_v53 = vpack.c.bf16 %v3060_v51, %v3052_v46 }
 0x785   : > { %2364 = vst.msk [vmem:[%s3752_s21 + $0x34] sm:$0xf] %vm2359_vm8, %v2625_v45  ;;  %v2624_v54 = vpack.c.bf16 %v3062_v52, %v3054_v47 }
 0x786   : > { %2358 = vst [vmem:[%s3752_s21 + $0x10] sm:$0xff] %v2620_v53 }
 0x787   : > { %2363 = vst [vmem:[%s3752_s21 + $0x2c] sm:$0xff] %v2624_v54 }
 0x788   : > { %3076 = shalt.err (!%p3073_p3)
}
 0x789   : > { %s3077_s29 = scalar_lea.hbm %s3764_s26, 896  ;;  %s3081_s18 = scalar_lea.hbm %s3853_s19, 1792 }
 0x78a   : > { %p3078_p4 = scmp.ne.s32.totalorder %s3764_s26, %s3077_s29  ;;  %p3082_p9 = scmp.lt.u32.totalorder %s3764_s26, %s3853_s19 }
 0x78b   : > { %p3083_p10 = scmp.lt.u32.totalorder %s3081_s18, %s3077_s29  ;;  %p3085_p12 = scmp.lt.u32.totalorder %s3077_s29, %s3764_s26 }
 0x78c   : > { %p3079_p7 = pnand %p3078_p4, %p3262_p5 }
 0x78d   : > { %p3084_p11 = por %p3083_p10, %p3082_p9 }
 0x78e   : > { %p3080_p8 = pneg %p3079_p7 }
 0x78f   : > { %p3086_p13 = por %p3085_p12, %p3084_p11 }
 0x791   : > { %p3087_p0 = pnand %p3086_p13, %p3080_p8 }
 0x793   : > { %3090 = shalt.err (!%p3087_p0)
}
 0x794   : > { %s3132_s0 = smov 448   ;;  %s3133_s17 = smov 28  }
 0x795   : > { %2819 = dma.vmem_to_hbm [thread:$0]  (%p3262_p5), %s3766_s20, 896, %s3764_s26, %s3773_s28, %s3132_s0, %s3132_s0, %s3133_s17  }
 0x796 PF: > { %s3854_s30 = sld [smem:[#allocation7_spill]]  ;;  %s3855_s21 = sld [smem:[#allocation5_spill]] }
 0x79c   : > { %p2825_p1 = scmp.ge.s32.totalorder %s3854_s30, 2  ;;  %s2395_s27 = sand.u32 1, %s3855_s21  }
 0x79d   : > { %s2396_s29 = scalar_lea.sflag [#allocation3], %s2395_s27 }
 0x79e   : > { %p2822_p2 = pnand %p2825_p1, %p3266_p6 }
 0x7a0   : > { %3108 = dma.done.wait (!%p2822_p2), %s2396_s29, 896  }
 0x7a1   : > { %3110 = vsyncadd (!%p2822_p2), %s2396_s29, 4294966400  ;;  %s3857_s27 = sld [smem:[#allocation8_spill]]  ;;  %s3858_s18 = sld [smem:[#allocation6_spill]] }
 0x7a2   : > { %s3859_s26 = sld [smem:[#allocation9_spill]]  ;;  %s3860_s24 = smov %s3117_s25 }
 0x7a7   : > { %p27_p3 = scmp.ge.s32.totalorder %s3857_s27, 4   ;;  %s3861_s25 = smov %s3858_s18 }
 0x7a9   :  { %29 = sbr.rel (!%p27_p3) target bundleno = 7 (0x7), region = 123 }
 0x7b0   :  { %2401 = vsyncpa [#allocation3], 1 }
 0x7b1   :  { %2403 = vsyncpa [#allocation3 + $0x1], 1 }

</bundles_post_ra>
